<compile_context>
chip_gen: v5e
topology: v5e:2x2
jax: 0.10.0
libtpu: 0.0.40
codegen_flags: <defaults>
</compile_context>

<pallas_src>
import jax
import jax.numpy as jnp
from jax.experimental import pallas as pl
from jax.experimental.pallas import tpu as pltpu


def _round_up(x, m):
    return (x + m - 1) // m * m


def _lcm_mapper_kernel(x_ref, w1_ref, b1_ref, w23_ref, b23_ref, out_ref):
    """Fused LCMMapper tile: SiLU(x@W1 + b1) @ (W2@W3) + (b2@W3 + b3)."""
    # mapper[0]: Linear(feat -> hidden_pad); accumulate in f32 on the MXU.
    h = jnp.dot(x_ref[...], w1_ref[...], preferred_element_type=jnp.float32)
    h = h + b1_ref[...]                     # (1, Hp) f32 broadcast over rows
    # mapper[1]: SiLU in f32 (EUP sigmoid + VPU mul).
    h = h * jax.nn.sigmoid(h)
    # mapper[2] + output_layer, pre-fused into one affine map.
    o = jnp.dot(h.astype(w23_ref.dtype), w23_ref[...],
                preferred_element_type=jnp.float32)
    o = o + b23_ref[...]                    # (1, OUT_PAD) f32 broadcast
    out_ref[...] = o.astype(out_ref.dtype)


def lcm_mapper_forward(x, params, *, tile_n=512, matmul_dtype=jnp.bfloat16):
    """x: (B, P, C) -> offsets: (B, P, 4)."""
    B, P, C = x.shape
    w1, b1, w2, b2, w3, b3 = params         # weights stored (in, out), bias (out,)
    f32 = jnp.float32

    H = w1.shape[1]                         # hidden_dim = int(C * 4 / 3)
    OUT = w3.shape[1]                       # 4
    Hp = _round_up(H, 128)                  # pad hidden to lane/sublane friendly
    OUT_PAD = _round_up(OUT, 128)           # lane-dense output stores

    # --- Algebraic fusion of the two trailing affine layers (exact). ---
    w23 = jnp.dot(w2.astype(f32), w3.astype(f32))                      # (H, 4)
    b23 = jnp.dot(b2.astype(f32)[None, :], w3.astype(f32))[0] + b3.astype(f32)

    # --- Zero-padded, kernel-ready parameters (padding is mathematically exact:
    #     SiLU(0) == 0 and padded w23 rows/cols are zero). ---
    w1_p = jnp.zeros((C, Hp), matmul_dtype).at[:, :H].set(w1.astype(matmul_dtype))
    b1_p = jnp.zeros((1, Hp), f32).at[:, :H].set(b1.astype(f32)[None, :])
    w23_p = jnp.zeros((Hp, OUT_PAD), matmul_dtype).at[:H, :OUT].set(
        w23.astype(matmul_dtype))
    b23_p = jnp.zeros((1, OUT_PAD), f32).at[:, :OUT].set(b23[None, :])

    # --- Flatten rows, pick row tile, pad N to a multiple of it. ---
    N = B * P
    tile_n = min(tile_n, max(8, _round_up(N, 8)))
    N_pad = _round_up(N, tile_n)
    x2d = x.reshape(N, C).astype(matmul_dtype)
    if N_pad != N:
        x2d = jnp.zeros((N_pad, C), matmul_dtype).at[:N].set(x2d)

    grid = (N_pad // tile_n,)

    # --- VMEM budget: double-buffered x/out tiles + resident weights. ---
    in_bytes = jnp.dtype(matmul_dtype).itemsize
    out_bytes = jnp.dtype(x.dtype).itemsize
    tile_vmem = 2 * (tile_n * C * in_bytes + tile_n * OUT_PAD * out_bytes)
    weight_vmem = 2 * ((C * Hp + Hp * OUT_PAD) * in_bytes + (Hp + OUT_PAD) * 4)
    vmem_limit = int(min(max(tile_vmem + weight_vmem + (8 << 20), 16 << 20),
                         32 << 20))

    out = pl.pallas_call(
        _lcm_mapper_kernel,
        out_shape=jax.ShapeDtypeStruct((N_pad, OUT_PAD), x.dtype),
        grid=grid,
        in_specs=[
            pl.BlockSpec((tile_n, C), lambda i: (i, 0)),        # x rows, tiled
            pl.BlockSpec((C, Hp), lambda i: (0, 0)),            # resident W1
            pl.BlockSpec((1, Hp), lambda i: (0, 0)),            # resident b1
            pl.BlockSpec((Hp, OUT_PAD), lambda i: (0, 0)),      # resident W2@W3
            pl.BlockSpec((1, OUT_PAD), lambda i: (0, 0)),       # resident b2@W3+b3
        ],
        out_specs=pl.BlockSpec((tile_n, OUT_PAD), lambda i: (i, 0)),
        compiler_params=pltpu.CompilerParams(
            dimension_semantics=("parallel",),
            vmem_limit_bytes=vmem_limit),
    )(x2d, w1_p, b1_p, w23_p, b23_p)

    return out[:N, :OUT].reshape(B, P, OUT)


def init_lcm_mapper_params(key, feat_channels, dtype=jnp.float32):
    """Deterministic xavier_uniform_ weights, zero biases (as in __init__)."""
    hidden_dim = int(feat_channels * 4 / 3)

    def xavier(k, fan_in, fan_out):
        bound = (6.0 / (fan_in + fan_out)) ** 0.5
        # stored as (in, out) so the kernel computes x @ W
        return jax.random.uniform(k, (fan_in, fan_out), dtype,
                                  minval=-bound, maxval=bound)

    k1, k2, k3 = jax.random.split(key, 3)
    w1 = xavier(k1, feat_channels, hidden_dim)
    b1 = jnp.zeros((hidden_dim,), dtype)
    w2 = xavier(k2, hidden_dim, feat_channels)
    b2 = jnp.zeros((feat_channels,), dtype)
    w3 = xavier(k3, feat_channels, 4)
    b3 = jnp.zeros((4,), dtype)
    return (w1, b1, w2, b2, w3, b3)


def _reference_forward(x, params):
    """Pure-JAX reference (matches PyTorch module exactly)."""
    w1, b1, w2, b2, w3, b3 = params
    h = x @ w1 + b1
    h = h * jax.nn.sigmoid(h)
    f = h @ w2 + b2
    return f @ w3 + b3


if __name__ == "__main__":
    key = jax.random.PRNGKey(0)
    k_x, k_p = jax.random.split(key)

    feat_channels = 32          # -> hidden_dim = int(32 * 4 / 3) = 42
    batch, num_proposals = 2, 8
    x = jax.random.normal(k_x, (batch, num_proposals, feat_channels),
                          jnp.float32)
    params = init_lcm_mapper_params(k_p, feat_channels)

    ref = _reference_forward(x, params)

    # Exact path (f32 matmul operands): tight tolerance.
    out_f32 = jax.block_until_ready(
        lcm_mapper_forward(x, params, matmul_dtype=jnp.float32))
    assert out_f32.shape == (batch, num_proposals, 4)
    assert jnp.allclose(out_f32, ref, atol=1e-4, rtol=1e-4)

    # Fast path (bf16 matmul operands, f32 accumulation): looser tolerance.
    out_bf16 = jax.block_until_ready(
        lcm_mapper_forward(x, params, matmul_dtype=jnp.bfloat16))
    assert out_bf16.shape == (batch, num_proposals, 4)
    assert jnp.allclose(out_bf16, ref, atol=1e-1, rtol=1e-1)

    print("KERNEL_OK")
</pallas_src>

<mosaic_0001>
module attributes {stable_mosaic.version = 11 : i64} {
  func.func @_lcm_mapper_kernel(%arg0: i32, %arg1: memref<16x32xf32, #tpu.memory_space<vmem>>, %arg2: memref<32x128xf32, #tpu.memory_space<vmem>>, %arg3: memref<1x128xf32, #tpu.memory_space<vmem>>, %arg4: memref<128x128xf32, #tpu.memory_space<vmem>>, %arg5: memref<1x128xf32, #tpu.memory_space<vmem>>, %arg6: memref<16x128xf32, #tpu.memory_space<vmem>>) attributes {dimension_semantics = [#tpu.dimension_semantics<parallel>], iteration_bounds = array<i64: 1>, scalar_prefetch = 0 : i64, scratch_operands = 0 : i64, tpu.core_type = #tpu.core_type<tc>, window_params = [{transform_indices = @transform_0, window_bounds = array<i64: 16, 32>}, {pipeline_mode = #tpu.pipeline_mode<synchronous>, transform_indices = @transform_1, window_bounds = array<i64: 32, 128>}, {pipeline_mode = #tpu.pipeline_mode<synchronous>, transform_indices = @transform_2, window_bounds = array<i64: 1, 128>}, {pipeline_mode = #tpu.pipeline_mode<synchronous>, transform_indices = @transform_3, window_bounds = array<i64: 128, 128>}, {pipeline_mode = #tpu.pipeline_mode<synchronous>, transform_indices = @transform_4, window_bounds = array<i64: 1, 128>}, {transform_indices = @transform_5, window_bounds = array<i64: 16, 128>}]} {
    %c0 = arith.constant 0 : index
    %c0_0 = arith.constant 0 : index
    %0 = vector.load %arg1[%c0, %c0_0] : memref<16x32xf32, #tpu.memory_space<vmem>>, vector<16x32xf32>
    %c0_1 = arith.constant 0 : index
    %c0_2 = arith.constant 0 : index
    %1 = vector.load %arg2[%c0_1, %c0_2] : memref<32x128xf32, #tpu.memory_space<vmem>>, vector<32x128xf32>
    %cst = arith.constant dense<0.000000e+00> : vector<16x128xf32>
    %2 = tpu.matmul %0, %1, %cst {dimension_numbers = #tpu.dot_dimension_numbers<[1], [0], [0], [1], [0, 0, 1, 1], [], []>} : vector<16x32xf32>, vector<32x128xf32>, vector<16x128xf32> -> vector<16x128xf32>
    %c0_3 = arith.constant 0 : index
    %c0_4 = arith.constant 0 : index
    %3 = vector.load %arg3[%c0_3, %c0_4] : memref<1x128xf32, #tpu.memory_space<vmem>>, vector<1x128xf32>
    %4 = vector.broadcast %3 : vector<1x128xf32> to vector<16x128xf32>
    %5 = arith.addf %2, %4 : vector<16x128xf32>
    %6 = arith.negf %5 : vector<16x128xf32>
    %7 = math.exp %6 : vector<16x128xf32>
    %cst_5 = arith.constant 1.000000e+00 : f32
    %8 = vector.broadcast %cst_5 : f32 to vector<16x128xf32>
    %9 = arith.addf %8, %7 : vector<16x128xf32>
    %10 = arith.divf %8, %9 : vector<16x128xf32>
    %11 = arith.mulf %5, %10 : vector<16x128xf32>
    %c0_6 = arith.constant 0 : index
    %c0_7 = arith.constant 0 : index
    %12 = vector.load %arg4[%c0_6, %c0_7] : memref<128x128xf32, #tpu.memory_space<vmem>>, vector<128x128xf32>
    %cst_8 = arith.constant dense<0.000000e+00> : vector<16x128xf32>
    %13 = tpu.matmul %11, %12, %cst_8 {dimension_numbers = #tpu.dot_dimension_numbers<[1], [0], [0], [1], [0, 0, 1, 1], [], []>} : vector<16x128xf32>, vector<128x128xf32>, vector<16x128xf32> -> vector<16x128xf32>
    %c0_9 = arith.constant 0 : index
    %c0_10 = arith.constant 0 : index
    %14 = vector.load %arg5[%c0_9, %c0_10] : memref<1x128xf32, #tpu.memory_space<vmem>>, vector<1x128xf32>
    %15 = vector.broadcast %14 : vector<1x128xf32> to vector<16x128xf32>
    %16 = arith.addf %13, %15 : vector<16x128xf32>
    %c0_11 = arith.constant 0 : index
    %c0_12 = arith.constant 0 : index
    %17 = vector.load %arg6[%c0_11, %c0_12] : memref<16x128xf32, #tpu.memory_space<vmem>>, vector<16x128xf32>
    tpu.vector_store %arg6[%c0_11, %c0_12], %16 {strides = array<i32>} : memref<16x128xf32, #tpu.memory_space<vmem>>, vector<16x128xf32>,
    return
  }
  func.func @transform_0(%arg0: i32) -> (i32, i32) {
    %c0_i32 = arith.constant 0 : i32
    %c0_i32_0 = arith.constant 0 : i32
    return %arg0, %c0_i32 : i32, i32
  }
  func.func @transform_1(%arg0: i32) -> (i32, i32) {
    %c0_i32 = arith.constant 0 : i32
    %c0_i32_0 = arith.constant 0 : i32
    %c0_i32_1 = arith.constant 0 : i32
    return %c0_i32, %c0_i32_0 : i32, i32
  }
  func.func @transform_2(%arg0: i32) -> (i32, i32) {
    %c0_i32 = arith.constant 0 : i32
    %c0_i32_0 = arith.constant 0 : i32
    %c0_i32_1 = arith.constant 0 : i32
    return %c0_i32, %c0_i32_0 : i32, i32
  }
  func.func @transform_3(%arg0: i32) -> (i32, i32) {
    %c0_i32 = arith.constant 0 : i32
    %c0_i32_0 = arith.constant 0 : i32
    %c0_i32_1 = arith.constant 0 : i32
    return %c0_i32, %c0_i32_0 : i32, i32
  }
  func.func @transform_4(%arg0: i32) -> (i32, i32) {
    %c0_i32 = arith.constant 0 : i32
    %c0_i32_0 = arith.constant 0 : i32
    %c0_i32_1 = arith.constant 0 : i32
    return %c0_i32, %c0_i32_0 : i32, i32
  }
  func.func @transform_5(%arg0: i32) -> (i32, i32) {
    %c0_i32 = arith.constant 0 : i32
    %c0_i32_0 = arith.constant 0 : i32
    return %arg0, %c0_i32 : i32, i32
  }
}

</mosaic_0001>

<bundles_post_ra>
// kernel: tpu_custom_call.1
= control target key start
LH: loop header
LB: loop body
LE: loop exit
PB: predicated region body
PF: predicated region fallthrough
CT: control target
= control target key end

     0   :  { %10 = vsyncpa [#allocation3], 0  ;;  %s417_s0 = inlined_call_operand.hbm [shape: f32[16,32], index: 0, kind: input, shape index: {}]   ;;  %s418_s1 = inlined_call_operand.hbm [shape: f32[32,128], index: 1, kind: input, shape index: {}]   ;;  %s419_s2 = inlined_call_operand.vmem [shape: f32[1,128], index: 2, kind: input, shape index: {}]   ;;  %s420_s3 = inlined_call_operand.hbm [shape: f32[128,128], index: 3, kind: input, shape index: {}]   ;;  %s421_s4 = inlined_call_operand.vmem [shape: f32[1,128], index: 4, kind: input, shape index: {}]   ;;  %s422_s5 = inlined_call_operand.hbm [shape: f32[16,128], index: 5, kind: output, shape index: {}]  }
   0x1   :  { %11 = vsyncpa [#allocation6], 0 }
   0x2   :  { %12 = vsyncpa [#allocation4], 0  ;;  %s30_s20 = sshll.u32 %s418_s1, 4  ;;  %s351_s21 = smov [#allocation5]   ;;  %s31_s20 = int_to_ptr.hbm [resolvable:$true] %s30_s20 }
   0x3   :  { %s32_s22 = sshll.u32 %s351_s21, 4  ;;  %s17_s25 = sshll.u32 %s417_s0, 4  ;;  %s33_s22 = int_to_ptr.vmem [resolvable:$true] %s32_s22  ;;  %s18_s25 = int_to_ptr.hbm [resolvable:$true] %s17_s25 }
   0x4   :  { %s352_s26 = smov 128   ;;  %s353_s27 = smov 8  }
   0x5   :  { %38 = dma.hbm_to_vmem [thread:$0]  %s31_s20, 512, %s33_s22, [#allocation6], %s352_s26, %s352_s26, %s353_s27  }
   0x6   :  { %s354_s28 = smov [#allocation2]   ;;  %s45_s1 = sshll.u32 %s420_s3, 4  ;;  %s46_s1 = int_to_ptr.hbm [resolvable:$true] %s45_s1 }
   0x7   :  { %s19_s29 = sshll.u32 %s354_s28, 4  ;;  %s355_s0 = smov [#allocation7]   ;;  %s20_s29 = int_to_ptr.vmem [resolvable:$true] %s19_s29 }
   0x8   :  { %25 = dma.hbm_to_vmem [thread:$0]  %s18_s25, 256, %s20_s29, [#allocation3], %s352_s26, %s352_s26, %s353_s27  }
   0x9   :  { %s47_s7 = sshll.u32 %s355_s0, 4  ;;  %s48_s7 = int_to_ptr.vmem [resolvable:$true] %s47_s7 }
   0xa   :  { %53 = dma.hbm_to_vmem [thread:$0]  %s46_s1, 2048, %s48_s7, [#allocation6], %s352_s26, %s352_s26, %s353_s27  }
   0xb   :  { %345 = dma.done.wait [#allocation3], 256  }
   0xc   :  { %346 = vsyncadd [#allocation3], 4294967040 }
   0xd   :  { %347 = dma.done.wait [#allocation6], 2560  }
   0xe   :  { %348 = vsyncadd [#allocation6], 4294964736  ;;  %v73_v0 = vld [vmem:[#allocation5 + $0x18] sm:$0xff]  ;;  %v72_v1 = vld [vmem:[#allocation5 + $0x10] sm:$0xff]  ;;  %vm78_vm0 = vcmask 261120   ;;  %s356_s10 = smov [#allocation8]  }
   0xf   :  { %97 = vmatpush.msra.mxu0 %v73_v0  ;;  %v71_v2 = vld [vmem:[#allocation5 + $0x8] sm:$0xff]  ;;  %v70_v3 = vld [vmem:[#allocation5] sm:$0xff]  ;;  %v68_v4 = vld [vmem:[#allocation2] sm:$0xff]  ;;  %s197_s11 = sshll.u32 %s356_s10, 4  ;;  %s199_s14 = sshll.u32 %s422_s5, 4  ;;  %s198_s11 = int_to_ptr.vmem [resolvable:$true] %s197_s11  ;;  %s200_s14 = int_to_ptr.hbm [resolvable:$true] %s199_s14 }
  0x10   :  { %v69_v5 = vld [vmem:[#allocation2 + $0x8] sm:$0xff]  ;;  %v162_v7 = vld [vmem:[#allocation7 + $0x70] sm:$0xff]  ;;  %v161_v8 = vld [vmem:[#allocation7 + $0x68] sm:$0xff] }
  0x11   :  { %98 = vmatpush.msra.mxu0 %v72_v1  ;;  %v163_v6 = vld [vmem:[#allocation7 + $0x78] sm:$0xff]  ;;  %v160_v9 = vld [vmem:[#allocation7 + $0x60] sm:$0xff]  ;;  %v158_v11 = vld [vmem:[#allocation7 + $0x50] sm:$0xff] }
  0x12   :  { %168 = vmatpush.msra.mxu1 %v163_v6  ;;  %217 = vmatpush.msra.mxu2 %v163_v6  ;;  %v159_v10 = vld [vmem:[#allocation7 + $0x58] sm:$0xff]  ;;  %v157_v12 = vld [vmem:[#allocation7 + $0x48] sm:$0xff]  ;;  %v156_v13 = vld [vmem:[#allocation7 + $0x40] sm:$0xff] }
  0x13   :  { %99 = vmatpush.msra.mxu0 %v71_v2  ;;  %v155_v14 = vld [vmem:[#allocation7 + $0x38] sm:$0xff]  ;;  %v154_v15 = vld [vmem:[#allocation7 + $0x30] sm:$0xff]  ;;  %v153_v16 = vld [vmem:[#allocation7 + $0x28] sm:$0xff] }
  0x14   :  { %169 = vmatpush.msra.mxu1 %v162_v7  ;;  %218 = vmatpush.msra.mxu2 %v162_v7  ;;  %v152_v17 = vld [vmem:[#allocation7 + $0x20] sm:$0xff]  ;;  %v151_v18 = vld [vmem:[#allocation7 + $0x18] sm:$0xff]  ;;  %v150_v19 = vld [vmem:[#allocation7 + $0x10] sm:$0xff] }
  0x15   :  { %100 = vmatpush.msra.mxu0 %v70_v3  ;;  %v149_v20 = vld [vmem:[#allocation7 + $0x8] sm:$0xff]  ;;  %v239_v21 = vld [vmem:[%s419_s2] ss:$0 sm:$0xff]  ;;  %v148_v22 = vld [vmem:[#allocation7] sm:$0xff] }
  0x16   :  { %213 = vmatmul.msk.f32.vlgmr.msra.gmra.mxu0 %vm78_vm0, %v68_v4  ;;  %170 = vmatpush.msra.mxu1 %v161_v8  ;;  %v240_v55 = vld [vmem:[%s421_s4] ss:$0 sm:$0xff] }
  0x17   :  { %219 = vmatpush.msra.mxu2 %v161_v8 }
  0x18   :  { %171 = vmatpush.msra.mxu1 %v160_v9 }
  0x19   :  { %220 = vmatpush.msra.mxu2 %v160_v9 }
  0x1a   :  { %172 = vmatpush.msra.mxu1 %v159_v10 }
  0x1b   :  { %221 = vmatpush.msra.mxu2 %v159_v10 }
  0x1c   :  { %173 = vmatpush.msra.mxu1 %v158_v11 }
  0x1d   :  { %222 = vmatpush.msra.mxu2 %v158_v11 }
  0x1e   :  { %214 = vmatmul.msk.f32.gmra.mxu0 %vm78_vm0, %v69_v5  ;;  %174 = vmatpush.msra.mxu1 %v157_v12 }
  0x1f   :  { %223 = vmatpush.msra.mxu2 %v157_v12 }
  0x20   :  { %175 = vmatpush.msra.mxu1 %v156_v13 }
  0x21   :  { %224 = vmatpush.msra.mxu2 %v156_v13 }
  0x22   :  { %176 = vmatpush.msra.mxu1 %v155_v14 }
  0x23   :  { %225 = vmatpush.msra.mxu2 %v155_v14 }
  0x24   :  { %177 = vmatpush.msra.mxu1 %v154_v15 }
  0x25   :  { %226 = vmatpush.msra.mxu2 %v154_v15 }
  0x26   :  { %178 = vmatpush.msra.mxu1 %v153_v16 }
  0x27   :  { %227 = vmatpush.msra.mxu2 %v153_v16 }
  0x28   :  { %179 = vmatpush.msra.mxu1 %v152_v17 }
  0x29   :  { %228 = vmatpush.msra.mxu2 %v152_v17 }
  0x2a   :  { %180 = vmatpush.msra.mxu1 %v151_v18 }
  0x2b   :  { %229 = vmatpush.msra.mxu2 %v151_v18 }
  0x2c   :  { %181 = vmatpush.msra.mxu1 %v150_v19 }
  0x2d   :  { %230 = vmatpush.msra.mxu2 %v150_v19 }
  0x2e   :  { %182 = vmatpush.msra.mxu1 %v149_v20 }
  0x2f   :  { %231 = vmatpush.msra.mxu2 %v149_v20 }
  0x30   :  { %183 = vmatpush.msra.mxu1 %v148_v22 }
  0x31   :  { %232 = vmatpush.msra.mxu2 %v148_v22 }
  0x93   :  { %v102_v23 = vpop.f32.mrf.mxu0 }
  0x94   :  { %v103_v24 = vadd.f32 %v239_v21, %v102_v23 }
  0x96   :  { %v215_v25 = vmul.f32 -1.442695, %v103_v24 }
  0x98   :  { %241 = vpow2.f32 %v215_v25 }
  0x9b   :  { %v105_v26 = vpop.f32.mrf.mxu0 }
  0x9c   :  { %v106_v27 = vadd.f32 %v239_v21, %v105_v26 }
  0x9e   :  { %v242_v28 = vpop.eup %241  ;;  %v216_v29 = vmul.f32 -1.442695, %v106_v27 }
  0x9f   :  { %v114_v30 = vadd.f32 1.0, %v242_v28 }
  0xa0   :  { %243 = vpow2.f32 %v216_v29 }
  0xa1   :  { %245 = vrcp.f32 %v114_v30  ;;  %v127_v36 = vand.u32 2147483648, %v114_v30  ;;  %v125_v38 = vand.u32 2147483647, %v114_v30  ;;  %vm121_vm2 = vweird.f32 %v114_v30 }
  0xa3   :  { %v128_v41 = vor.u32 1.1754944e-38, %v127_v36  ;;  %vm126_vm4 = vcmp.eq.f32.partialorder %v125_v38, 8.507059e+37 }
  0xa6   :  { %v244_v31 = vpop.eup %243 }
  0xa7   :  { %v246_v32 = vpop.eup %245  ;;  %v115_v33 = vadd.f32 1.0, %v244_v31 }
  0xa8   :  { %v117_v34 = vmul.f32 %v246_v32, %v114_v30  ;;  %vm122_vm1 = vweird.f32 %v246_v32 }
  0xa9   :  { %247 = vrcp.f32 %v115_v33  ;;  %vm123_vm3 = vmor %vm121_vm2, %vm122_vm1  ;;  %v142_v47 = vand.u32 2147483648, %v115_v33  ;;  %v140_v49 = vand.u32 2147483647, %v115_v33  ;;  %vm136_vm6 = vweird.f32 %v115_v33 }
  0xaa   :  { %v118_v35 = vsub.f32 1.0, %v117_v34 }
  0xab   :  { %v143_v51 = vor.u32 1.1754944e-38, %v142_v47  ;;  %vm141_vm8 = vcmp.eq.f32.partialorder %v140_v49, 8.507059e+37 }
  0xac   :  { %v119_v37 = vmul.f32 %v246_v32, %v118_v35 }
  0xae   :  { %v120_v39 = vadd.f32 %v246_v32, %v119_v37 }
  0xaf   :  { %v248_v40 = vpop.eup %247 }
  0xb0   :  { %v124_v42 = vsel %vm123_vm3, %v246_v32, %v120_v39  ;;  %v132_v43 = vmul.f32 %v248_v40, %v115_v33  ;;  %vm137_vm5 = vweird.f32 %v248_v40 }
  0xb1   :  { %v129_v44 = vsel %vm126_vm4, %v128_v41, %v124_v42  ;;  %vm138_vm7 = vmor %vm136_vm6, %vm137_vm5 }
  0xb2   :  { %v146_v45 = vmul.f32 %v129_v44, %v103_v24  ;;  %v133_v46 = vsub.f32 1.0, %v132_v43 }
  0xb4   :  { %184 = vmatmul.f32.vlgmr.msra.gmra.mxu1 %v146_v45  ;;  %v134_v48 = vmul.f32 %v248_v40, %v133_v46 }
  0xb6   :  { %v135_v50 = vadd.f32 %v248_v40, %v134_v48 }
  0xb8   :  { %v139_v52 = vsel %vm138_vm7, %v248_v40, %v135_v50 }
  0xb9   :  { %v144_v53 = vsel %vm141_vm8, %v143_v51, %v139_v52 }
  0xba   :  { %v147_v54 = vmul.f32 %v144_v53, %v106_v27 }
  0xbc   :  { %187 = vmatmul.f32.vlgmr.msra.gmra.mxu2 %v147_v54 }
 0x131   :  { %v185_v56 = vpop.f32.mrf.mxu1 }
 0x132   :  { %v186_v57 = vadd.f32 %v240_v55, %v185_v56 }
 0x134   :  { %191 = vst [vmem:[#allocation8] sm:$0xff] %v186_v57 }
 0x13f   :  { %v188_v58 = vpop.f32.mrf.mxu2 }
 0x140   :  { %v189_v59 = vadd.f32 %v240_v55, %v188_v58 }
 0x142   :  { %192 = vst [vmem:[#allocation8 + $0x8] sm:$0xff] %v189_v59 }
 0x143   :  { %205 = dma.vmem_to_hbm [thread:$0]  %s198_s11, 256, %s200_s14, [#allocation4], %s352_s26, %s352_s26, %s353_s27  }
 0x144   :  { %349 = dma.done.wait [#allocation4], 256  }
 0x145   :  { %350 = vsyncadd [#allocation4], 4294967040 }
 0x146   :  { %210 = vsyncpa [#allocation3], 1 }
 0x147   :  { %211 = vsyncpa [#allocation6], 1 }
 0x148   :  { %212 = vsyncpa [#allocation4], 1 }

</bundles_post_ra>
